<compile_context>
chip_gen: v6e
topology: v6e:2x2x1
jax: 0.10.0
libtpu: 0.0.40
codegen_flags: <defaults>
</compile_context>

<pallas_src>
import functools
import math

import jax
import jax.numpy as jnp
from jax.experimental import pallas as pl
from jax.experimental.pallas import tpu as pltpu


def _round_up(x, m):
    return (x + m - 1) // m * m


def _tpu_generation():
    """Best-effort TPU generation from device_kind (None if unknown)."""
    try:
        kind = jax.devices()[0].device_kind.lower()
    except Exception:
        return None
    if "v7" in kind or "tpu7" in kind:
        return 7
    if "v6" in kind:
        return 6
    if "v5" in kind:
        return 5
    if "v4" in kind:
        return 4
    return None


_ACTIVATIONS = {
    "relu": lambda v: jnp.maximum(v, 0.0),
    "identity": lambda v: v,
    "sigmoid": jax.nn.sigmoid,
    "tanh": jnp.tanh,
}


def _resolve_activation(act):
    # TODO(synk): PyTorch passes `activation` as a runtime callable; here it must be
    # a trace-time-static callable or one of the string names above.
    if callable(act):
        return act
    return _ACTIVATIONS[act]


def _step_footprint(bb, tN, N, Fin, Fp, third_pad, op_bytes, out_bytes, adj_buffers=2):
    """Approximate per-grid-step VMEM footprint (buffered tiles + f32 intermediates)."""
    x_blk = 2 * bb * N * Fin * op_bytes                 # double-buffered input tile
    adj_blk = adj_buffers * bb * tN * N * op_bytes      # buffered adjacency tile
    out_blk = 2 * bb * tN * Fp * out_bytes              # double-buffered output tile
    w_blk = 2 * Fin * Fp * op_bytes + 2 * Fp * 4        # resident weight + bias
    interm = 4 * (bb * N * third_pad                    # support head (f32)
                  + bb * tN * third_pad                 # propagation result (f32)
                  + 2 * bb * tN * Fp)                   # tile support + out temp (f32)
    return x_blk + adj_blk + out_blk + w_blk + interm


def gcn_kernel(x_ref, adj_ref, w_ref, b_ref, o_ref, *, third, third_pad, act_fn):
    # x_ref:   (Bb, N, Fin)        full-N batch block (adj matmul needs all support rows)
    # adj_ref: (Bb, tN, N)         row tile of the adjacency matrices
    # w_ref:   (Fin, Fp)           shared weight, Fout zero-padded to lane-dense Fp
    # b_ref:   (1, Fp)             shared bias (f32), zero-padded
    # o_ref:   (Bb, tN, Fp)        output row tile
    Bb, N, Fin = x_ref.shape
    Fp = w_ref.shape[-1]
    tN = o_ref.shape[1]

    # Merge (Bb, N) -> Bb*N rows for one big MXU matmul (layout-free when N % 8 == 0).
    x_all = x_ref[...].reshape(Bb * N, Fin)

    if tN == N:
        # Single row block: compute full-width support once and reuse both halves.
        support = jnp.dot(x_all, w_ref[...],
                          preferred_element_type=jnp.float32).reshape(Bb, N, Fp)
        sup_head = support[..., :third_pad]          # lane-aligned static slice
        sup_rows = support                            # tile rows == all rows
    else:
        # Head columns (feed the adj matmul) for ALL rows ...
        sup_head = jnp.dot(x_all, w_ref[:, :third_pad],
                           preferred_element_type=jnp.float32).reshape(Bb, N, third_pad)
        # ... full-width support only for this tile's rows (pass-through columns).
        row0 = pl.multiple_of(pl.program_id(1) * tN, tN)
        x_rows = x_ref[:, pl.ds(row0, tN), :].reshape(Bb * tN, Fin)
        sup_rows = jnp.dot(x_rows, w_ref[...],
                           preferred_element_type=jnp.float32).reshape(Bb, tN, Fp)

    # Graph propagation restricted to the 128-aligned head lanes actually used.
    adj = adj_ref[...]
    sup_prop = sup_head if adj.dtype == jnp.float32 else sup_head.astype(adj.dtype)
    prop = jnp.einsum("bnm,bmf->bnf", adj, sup_prop,
                      preferred_element_type=jnp.float32)      # (Bb, tN, third_pad) f32

    # Column select (VPU) replaces the unaligned slice+concat at `third`.
    col = jax.lax.broadcasted_iota(jnp.int32, (1, 1, third_pad), 2)
    head = jnp.where(col < third, prop, sup_rows[..., :third_pad])
    if third_pad == Fp:
        out = head
    else:
        out = jnp.concatenate([head, sup_rows[..., third_pad:]], axis=-1)

    out = out + b_ref[...]
    o_ref[...] = act_fn(out).astype(o_ref.dtype)      # single lane-dense full-tile store


def pad_gcn_params(weight1, bias, *, lane_pad=128, param_dtype=None):
    """Zero-pad the feature dim of weight/bias to a lane-dense multiple of 128.

    Call ONCE at init (not per forward) and feed the result to gcn_forward_padded so
    the forward path never pays the XLA pad + weight copy.
    """
    Fin, Fout = weight1.shape[-2], weight1.shape[-1]
    Fp = max(lane_pad, _round_up(Fout, lane_pad))
    w = jnp.asarray(weight1).reshape(Fin, Fout)
    if param_dtype is not None:
        w = w.astype(param_dtype)
    w_padded = jnp.zeros((Fin, Fp), dtype=w.dtype).at[:, :Fout].set(w)
    b_padded = jnp.zeros((1, Fp), dtype=jnp.float32)
    if bias is not None:
        b_padded = b_padded.at[:, :Fout].set(jnp.asarray(bias, jnp.float32))
    return w_padded, b_padded, Fout


def gcn_forward_padded(x, adj, w_padded, b_padded, out_features, *,
                       activation="relu", compute_dtype="auto", out_dtype=None,
                       batch_block=None, row_block=None, slice_output=True,
                       adj_buffers=2, vmem_budget_bytes=None):
    """x: (B,N,Fin), adj: (B,N,N), w_padded: (Fin,Fp), b_padded: (1,Fp)."""
    B, N, Fin = x.shape
    Fp = w_padded.shape[-1]
    Fout = out_features
    third = Fout // 3
    third_pad = min(Fp, max(128, _round_up(third, 128)))

    gen = _tpu_generation()

    # Operand dtype: bf16 halves the dominant adj HBM traffic and doubles MXU rate on
    # v6e/v7x; keep f32 on v5e (no bf16 VPU, low MXU peak).  f32 accumulation always.
    if compute_dtype == "auto":
        compute_dtype = jnp.bfloat16 if (gen is not None and gen >= 6) else None
    if out_dtype is None:
        out_dtype = x.dtype
    if compute_dtype is not None:
        x = x.astype(compute_dtype)
        adj = adj.astype(compute_dtype)
        if w_padded.dtype != jnp.dtype(compute_dtype):
            w_padded = w_padded.astype(compute_dtype)

    op_bytes = jnp.dtype(x.dtype).itemsize
    out_bytes = jnp.dtype(out_dtype).itemsize

    # Generation-aware VMEM budget (v7x has only 64 MiB physical per TC).
    if vmem_budget_bytes is None:
        vmem_budget_bytes = (24 << 20) if (gen is not None and gen >= 7) else (48 << 20)
    phys_cap = (48 << 20) if (gen is not None and gen >= 7) else (100 << 20)

    def step_bytes(bb_, tN_):
        return _step_footprint(bb_, tN_, N, Fin, Fp, third_pad,
                               op_bytes, out_bytes, adj_buffers)

    # ---- batch block: MXU row occupancy target + generation-aware folding ----------
    if batch_block is None:
        target_rows = 512 if gen == 5 else 256
        if gen is not None and gen >= 7:
            half = pl.cdiv(B, 2)
            bb = half if half * N >= target_rows else B   # 2 meaningful steps or fold to 1
        else:
            bb = B                                        # 1 TC: grid is a serial loop
        while bb > 1 and step_bytes(bb, N) > vmem_budget_bytes:
            bb = pl.cdiv(bb, 2)
    else:
        bb = max(1, min(batch_block, B))

    # ---- optional N-row tiling of adj/out (needed for large N on v7x/v6e) ----------
    if row_block is None:
        tN = N
        if step_bytes(bb, N) > vmem_budget_bytes and N % 8 == 0 and N > 8:
            divisors = [d for d in range(8, N, 8) if N % d == 0]
            fitting = [d for d in divisors if step_bytes(bb, d) <= vmem_budget_bytes]
            if fitting:
                tN = max(fitting)
            elif divisors:
                tN = min(divisors)
    else:
        tN = row_block
    if N % tN != 0:
        tN = N   # row tiling requires an exact divisor; fall back to full rows

    grid = (pl.cdiv(B, bb), N // tN)
    vmem_limit = int(min(phys_cap, max(32 << 20, 2 * step_bytes(bb, tN))))

    act_fn = _resolve_activation(activation)
    kernel = functools.partial(gcn_kernel, third=third, third_pad=third_pad,
                               act_fn=act_fn)

    adj_kwargs = {}
    if adj_buffers and adj_buffers > 2:
        # Deeper buffering only on the one large, changing input (adj DMA exposure).
        adj_kwargs["pipeline_mode"] = pl.Buffered(adj_buffers)

    out_padded = pl.pallas_call(
        kernel,
        out_shape=jax.ShapeDtypeStruct((B, N, Fp), out_dtype),
        grid=grid,
        in_specs=[
            pl.BlockSpec((bb, N, Fin), lambda b, r: (b, 0, 0)),            # inputs (full N)
            pl.BlockSpec((bb, tN, N), lambda b, r: (b, r, 0), **adj_kwargs),  # adjacency tile
            pl.BlockSpec((Fin, Fp), lambda b, r: (0, 0)),                  # shared weight
            pl.BlockSpec((1, Fp), lambda b, r: (0, 0)),                    # shared bias
        ],
        out_specs=pl.BlockSpec((bb, tN, Fp), lambda b, r: (b, r, 0)),
        compiler_params=pltpu.CompilerParams(
            dimension_semantics=("parallel", "parallel"),
            vmem_limit_bytes=vmem_limit,
        ),
    )(x, adj, w_padded, b_padded)

    if slice_output and Fp != Fout:
        # NOTE: this is an extra XLA copy over the padded array; pass
        # slice_output=False and consume the lane-padded (B, N, Fp) layout when the
        # downstream op allows it.
        return out_padded[:, :, :Fout]
    return out_padded


def gcn_forward(x, adj, weight1, bias, **kwargs):
    """Convenience wrapper matching the PyTorch signature (pads params per call).

    For production, call pad_gcn_params once at init and use gcn_forward_padded."""
    w_padded, b_padded, Fout = pad_gcn_params(weight1, bias)
    return gcn_forward_padded(x, adj, w_padded, b_padded, Fout, **kwargs)


def gcn_reference(x, adj, weight1, bias):
    support = jnp.matmul(x, weight1)                 # broadcast over batch
    third = support.shape[-1] // 3
    out = jnp.matmul(adj, support[:, :, :third])
    out = jnp.concatenate([out, support[:, :, third:]], axis=-1)
    out = out + bias
    return jnp.maximum(out, 0.0)                     # activation = ReLU


if __name__ == "__main__":
    B, N = 2, 16
    in_features, out_features = 32, 48               # out_features // 3 == 16

    key = jax.random.PRNGKey(0)
    kx, ka, kw, kb = jax.random.split(key, 4)

    x = jax.random.normal(kx, (B, N, in_features), dtype=jnp.float32)
    adj = jax.random.uniform(ka, (B, N, N), dtype=jnp.float32)

    # deterministic parameter init mirroring reset_parameters():
    #   stdv = 6.0 / sqrt(in_features + 1) * 0.3 ; weight ~ U(-stdv, stdv)
    #   bias ~ U(-0.1, 0.1)
    stdv = 6.0 / math.sqrt(in_features + 1) * 0.3
    weight1 = jax.random.uniform(kw, (1, in_features, out_features),
                                 minval=-stdv, maxval=stdv, dtype=jnp.float32)
    bias = jax.random.uniform(kb, (out_features,),
                              minval=-0.1, maxval=0.1, dtype=jnp.float32)

    ref = gcn_reference(x, adj, weight1, bias)

    # f32 operand path: exact comparison against the reference.
    out = gcn_forward(x, adj, weight1, bias, compute_dtype=jnp.float32)
    out = jax.block_until_ready(out)
    assert out.shape == (B, N, out_features)
    assert jnp.allclose(out, ref, atol=1e-5, rtol=1e-5)

    # Pre-padded params (padding hoisted out of the forward path) + padded-layout
    # output (no out-of-kernel slice copy).
    w_pad, b_pad, fout = pad_gcn_params(weight1, bias)
    out_pad = gcn_forward_padded(x, adj, w_pad, b_pad, fout,
                                 compute_dtype=jnp.float32, slice_output=False)
    out_pad = jax.block_until_ready(out_pad)
    assert out_pad.shape[-1] % 128 == 0
    assert jnp.allclose(out_pad[:, :, :fout], ref, atol=1e-5, rtol=1e-5)

    # Generation-default path (bf16 operands on v6e/v7x, f32 on v5e): sanity check.
    out_auto = gcn_forward(x, adj, weight1, bias)
    out_auto = jax.block_until_ready(out_auto)
    assert out_auto.shape == (B, N, out_features)
    assert bool(jnp.all(jnp.isfinite(out_auto)))

    print("KERNEL_OK")
</pallas_src>

<mosaic_0001>
module attributes {stable_mosaic.version = 11 : i64} {
  func.func @gcn_kernel(%arg0: i32, %arg1: i32, %arg2: memref<2x16x32xf32, #tpu.memory_space<vmem>>, %arg3: memref<2x16x16xf32, #tpu.memory_space<vmem>>, %arg4: memref<32x128xf32, #tpu.memory_space<vmem>>, %arg5: memref<1x128xf32, #tpu.memory_space<vmem>>, %arg6: memref<2x16x128xf32, #tpu.memory_space<vmem>>) attributes {dimension_semantics = [#tpu.dimension_semantics<parallel>, #tpu.dimension_semantics<parallel>], iteration_bounds = array<i64: 1, 1>, scalar_prefetch = 0 : i64, scratch_operands = 0 : i64, tpu.core_type = #tpu.core_type<tc>, window_params = [{transform_indices = @transform_0, window_bounds = array<i64: 2, 16, 32>}, {transform_indices = @transform_1, window_bounds = array<i64: 2, 16, 16>}, {pipeline_mode = #tpu.pipeline_mode<synchronous>, transform_indices = @transform_2, window_bounds = array<i64: 32, 128>}, {pipeline_mode = #tpu.pipeline_mode<synchronous>, transform_indices = @transform_3, window_bounds = array<i64: 1, 128>}, {transform_indices = @transform_4, window_bounds = array<i64: 2, 16, 128>}]} {
    %c0 = arith.constant 0 : index
    %c0_0 = arith.constant 0 : index
    %c0_1 = arith.constant 0 : index
    %0 = vector.load %arg2[%c0, %c0_0, %c0_1] : memref<2x16x32xf32, #tpu.memory_space<vmem>>, vector<2x16x32xf32>
    %1 = vector.shape_cast %0 : vector<2x16x32xf32> to vector<32x32xf32>
    %c0_2 = arith.constant 0 : index
    %c0_3 = arith.constant 0 : index
    %2 = vector.load %arg4[%c0_2, %c0_3] : memref<32x128xf32, #tpu.memory_space<vmem>>, vector<32x128xf32>
    %cst = arith.constant dense<0.000000e+00> : vector<32x128xf32>
    %3 = tpu.matmul %1, %2, %cst {dimension_numbers = #tpu.dot_dimension_numbers<[1], [0], [0], [1], [0, 0, 1, 1], [], []>} : vector<32x32xf32>, vector<32x128xf32>, vector<32x128xf32> -> vector<32x128xf32>
    %4 = vector.shape_cast %3 : vector<32x128xf32> to vector<2x16x128xf32>
    %c0_4 = arith.constant 0 : index
    %c0_5 = arith.constant 0 : index
    %c0_6 = arith.constant 0 : index
    %5 = vector.load %arg3[%c0_4, %c0_5, %c0_6] : memref<2x16x16xf32, #tpu.memory_space<vmem>>, vector<2x16x16xf32>
    "tpu.trace_start"() <{level = 10 : i32, message = "bnm,bmf->bnf"}> : () -> ()
    %cst_7 = arith.constant dense<0.000000e+00> : vector<2x16x128xf32>
    %6 = tpu.matmul %5, %4, %cst_7 {dimension_numbers = #tpu.dot_dimension_numbers<[2], [1], [1], [2], [0, 0, 0, 1, 1, 2], [0], [0]>} : vector<2x16x16xf32>, vector<2x16x128xf32>, vector<2x16x128xf32> -> vector<2x16x128xf32>
    "tpu.trace_stop"() : () -> ()
    %7 = tpu.iota {dimensions = array<i32: 2>} : vector<1x1x128xi32>
    %c16_i32 = arith.constant 16 : i32
    %8 = vector.broadcast %c16_i32 : i32 to vector<1x1x128xi32>
    %9 = arith.cmpi slt, %7, %8 : vector<1x1x128xi32>
    %10 = vector.shape_cast %9 : vector<1x1x128xi1> to vector<1x1x128xi1>
    %11 = vector.broadcast %10 : vector<1x1x128xi1> to vector<2x16x128xi1>
    %12 = arith.select %11, %6, %4 : vector<2x16x128xi1>, vector<2x16x128xf32>
    %c0_8 = arith.constant 0 : index
    %c0_9 = arith.constant 0 : index
    %13 = vector.load %arg5[%c0_8, %c0_9] : memref<1x128xf32, #tpu.memory_space<vmem>>, vector<1x128xf32>
    %14 = vector.shape_cast %13 : vector<1x128xf32> to vector<1x1x128xf32>
    %15 = vector.broadcast %14 : vector<1x1x128xf32> to vector<2x16x128xf32>
    %16 = arith.addf %12, %15 : vector<2x16x128xf32>
    %cst_10 = arith.constant 0.000000e+00 : f32
    %17 = vector.broadcast %cst_10 : f32 to vector<2x16x128xf32>
    %18 = arith.maximumf %16, %17 : vector<2x16x128xf32>
    %c0_11 = arith.constant 0 : index
    %c0_12 = arith.constant 0 : index
    %c0_13 = arith.constant 0 : index
    %19 = vector.load %arg6[%c0_11, %c0_12, %c0_13] : memref<2x16x128xf32, #tpu.memory_space<vmem>>, vector<2x16x128xf32>
    tpu.vector_store %arg6[%c0_11, %c0_12, %c0_13], %18 {strides = array<i32>} : memref<2x16x128xf32, #tpu.memory_space<vmem>>, vector<2x16x128xf32>,
    return
  }
  func.func @transform_0(%arg0: i32, %arg1: i32) -> (i32, i32, i32) {
    %c0_i32 = arith.constant 0 : i32
    %c0_i32_0 = arith.constant 0 : i32
    %c0_i32_1 = arith.constant 0 : i32
    return %arg0, %c0_i32, %c0_i32_0 : i32, i32, i32
  }
  func.func @transform_1(%arg0: i32, %arg1: i32) -> (i32, i32, i32) {
    %c0_i32 = arith.constant 0 : i32
    %c0_i32_0 = arith.constant 0 : i32
    return %arg0, %arg1, %c0_i32 : i32, i32, i32
  }
  func.func @transform_2(%arg0: i32, %arg1: i32) -> (i32, i32) {
    %c0_i32 = arith.constant 0 : i32
    %c0_i32_0 = arith.constant 0 : i32
    %c0_i32_1 = arith.constant 0 : i32
    return %c0_i32, %c0_i32_0 : i32, i32
  }
  func.func @transform_3(%arg0: i32, %arg1: i32) -> (i32, i32) {
    %c0_i32 = arith.constant 0 : i32
    %c0_i32_0 = arith.constant 0 : i32
    %c0_i32_1 = arith.constant 0 : i32
    return %c0_i32, %c0_i32_0 : i32, i32
  }
  func.func @transform_4(%arg0: i32, %arg1: i32) -> (i32, i32, i32) {
    %c0_i32 = arith.constant 0 : i32
    %c0_i32_0 = arith.constant 0 : i32
    return %arg0, %arg1, %c0_i32 : i32, i32, i32
  }
}

</mosaic_0001>

<bundles_post_ra>
// kernel: tpu_custom_call.1
= control target key start
LH: loop header
LB: loop body
LE: loop exit
PB: predicated region body
PF: predicated region fallthrough
CT: control target
= control target key end

     0   :  { %9 = vsyncpa [#allocation3], 0  ;;  %s589_s0 = inlined_call_operand.hbm [shape: f32[2,16,32], index: 0, kind: input, shape index: {}]   ;;  %s590_s1 = inlined_call_operand.hbm [shape: f32[2,16,16], index: 1, kind: input, shape index: {}]   ;;  %s591_s2 = inlined_call_operand.hbm [shape: f32[32,128], index: 2, kind: input, shape index: {}]   ;;  %s592_s3 = inlined_call_operand.vmem [shape: f32[1,128], index: 3, kind: input, shape index: {}]   ;;  %s593_s4 = inlined_call_operand.hbm [shape: f32[2,16,128], index: 4, kind: output, shape index: {}]  }
   0x1   :  { %10 = vsyncpa [#allocation6], 0 }
   0x2   :  { %11 = vsyncpa [#allocation4], 0  ;;  %s523_s15 = smov [#allocation5]   ;;  %s524_s17 = smov [#allocation2]  }
   0x3   :  { %s29_s16 = sshll.u32 %s523_s15, 4  ;;  %s17_s18 = sshll.u32 %s524_s17, 4  ;;  %s30_s16 = int_to_ptr.vmem [resolvable:$true] %s29_s16  ;;  %s18_s18 = int_to_ptr.vmem [resolvable:$true] %s17_s18 }
   0x4   :  { %s445_s19 = scalar_lea.vmem %s30_s16, 512  ;;  %p450_p1 = scmp.lt.s32.totalorder %s30_s16, %s30_s16 }
   0x5   :  { %p446_p0 = scmp.ne.s32.totalorder %s30_s16, %s445_s19  ;;  %p451_p2 = scmp.lt.s32.totalorder %s445_s19, %s445_s19 }
   0x7   :  { %p452_p3 = por %p451_p2, %p450_p1 }
   0x9   :  { %p453_p4 = pnand %p452_p3, %p446_p0 }
   0xb   :  { %456 = shalt.err (!%p453_p4)
}
   0xc   :  { %s525_s20 = smov 128   ;;  %s526_s21 = smov 8  }
   0xd   :  { %35 = dma.hbm_to_vmem [thread:$0]  %s590_s1, 512, %s30_s16, [#allocation6], %s525_s20, %s525_s20, %s526_s21  }
   0xe   :  { %s465_s24 = scalar_lea.vmem %s18_s18, 512  ;;  %p470_p6 = scmp.lt.s32.totalorder %s18_s18, %s18_s18 }
   0xf   :  { %p466_p5 = scmp.ne.s32.totalorder %s18_s18, %s465_s24  ;;  %p471_p7 = scmp.lt.s32.totalorder %s465_s24, %s465_s24 }
  0x11   :  { %p472_p8 = por %p471_p7, %p470_p6 }
  0x13   :  { %p473_p9 = pnand %p472_p8, %p466_p5 }
  0x15   :  { %476 = shalt.err (!%p473_p9)
}
  0x16   :  { %23 = dma.hbm_to_vmem [thread:$0]  %s589_s0, 512, %s18_s18, [#allocation3], %s525_s20, %s525_s20, %s526_s21  }
  0x17   :  { %s527_s27 = smov [#allocation7]  }
  0x18   :  { %s41_s28 = sshll.u32 %s527_s27, 4  ;;  %s42_s28 = int_to_ptr.vmem [resolvable:$true] %s41_s28 }
  0x19   :  { %s485_s29 = scalar_lea.vmem %s42_s28, 512  ;;  %p490_p11 = scmp.lt.s32.totalorder %s42_s28, %s42_s28 }
  0x1a   :  { %p486_p10 = scmp.ne.s32.totalorder %s42_s28, %s485_s29  ;;  %p491_p12 = scmp.lt.s32.totalorder %s485_s29, %s485_s29 }
  0x1c   :  { %p492_p13 = por %p491_p12, %p490_p11 }
  0x1e   :  { %p493_p0 = pnand %p492_p13, %p486_p10 }
  0x20   :  { %496 = shalt.err (!%p493_p0)
}
  0x21   :  { %47 = dma.hbm_to_vmem [thread:$0]  %s591_s2, 512, %s42_s28, [#allocation6], %s525_s20, %s525_s20, %s526_s21  }
  0x22   :  { %517 = dma.done.wait [#allocation3], 512  }
  0x23   :  { %518 = vsyncadd [#allocation3], 4294966784 }
  0x24   :  { %519 = dma.done.wait [#allocation6], 1024  }
  0x25   :  { %520 = vsyncadd [#allocation6], 4294966272  ;;  %vm67_vm0 = vcmask 261120   ;;  %v66_v0 = vld [vmem:[#allocation7 + $0x18] sm:$0xff]  ;;  %v65_v1 = vld [vmem:[#allocation7 + $0x10] sm:$0xff]  ;;  %vm169_vm1 = vcmask 130048   ;;  %v332_v16 = vlaneseq }
  0x26   :  { %403 = vmatprep.subr.mxu0 %v66_v0  ;;  %v59_v2 = vld [vmem:[#allocation2] sm:$0xff]  ;;  %v64_v3 = vld [vmem:[#allocation7 + $0x8] sm:$0xff]  ;;  %v61_v6 = vld [vmem:[#allocation2 + $0x10] sm:$0xff]  ;;  %s528_s5 = smov [#allocation8]  }
  0x27   :  { %404 = vmatpush3.msra.mxu0 %v66_v0  ;;  %411 = vmatprep.mubr.msk.f32.mxu0 %vm67_vm0, %v59_v2  ;;  %v63_v4 = vld [vmem:[#allocation7] sm:$0xff]  ;;  %v60_v5 = vld [vmem:[#allocation2 + $0x8] sm:$0xff]  ;;  %v62_v7 = vld [vmem:[#allocation2 + $0x18] sm:$0xff]  ;;  %v333_v17 = vand.u32 127, %v332_v16  ;;  %s365_s6 = sshll.u32 %s528_s5, 4  ;;  %s366_s6 = int_to_ptr.vmem [resolvable:$true] %s365_s6 }
  0x28   :  { %405 = vmatprep.subr.mxu0 %v65_v1  ;;  %v165_v8 = vld [vmem:[#allocation5] sm:$0xff]  ;;  %v166_v11 = vld [vmem:[#allocation5 + $0x8] sm:$0xff]  ;;  %v167_v12 = vld [vmem:[#allocation5 + $0x10] sm:$0xff]  ;;  %p502_p2 = scmp.lt.s32.totalorder %s366_s6, %s366_s6 }
  0x29   :  { %406 = vmatpush3.msra.mxu0 %v65_v1  ;;  %421 = vmatprep.mubr.msk.f32.mxu1 %vm169_vm1, %v165_v8  ;;  %v168_v15 = vld [vmem:[#allocation5 + $0x18] sm:$0xff]  ;;  %vm334_vm2 = vcmp.lt.s32.totalorder %v333_v17, 16  ;;  %v386_v18 = vld [vmem:[%s592_s3] ss:$0 sm:$0xff]  ;;  %s497_s3 = scalar_lea.vmem %s366_s6, 512 }
  0x2a   :  { %407 = vmatprep.subr.mxu0 %v64_v3  ;;  %p498_p1 = scmp.ne.s32.totalorder %s366_s6, %s497_s3  ;;  %p503_p3 = scmp.lt.s32.totalorder %s497_s3, %s497_s3 }
  0x2b   :  { %408 = vmatpush3.msra.mxu0 %v64_v3 }
  0x2c   :  { %409 = vmatprep.subr.mxu0 %v63_v4  ;;  %p504_p4 = por %p503_p3, %p502_p2 }
  0x2d   :  { %410 = vmatpush3.msra.mxu0 %v63_v4 }
  0x2e   :  { %412 = vmatmul.mubr.msk.f32.vlgmr.msra.gmra.mxu0 %vm67_vm0, %v60_v5  ;;  %p505_p5 = pnand %p504_p4, %p498_p1 }
  0x2f   :  { %414 = vmatprep.mubr.msk.f32.mxu0 %vm67_vm0, %v61_v6 }
  0x32   :  { %415 = vmatmul.mubr.msk.f32.gmra.mxu0 %vm67_vm0, %v62_v7 }
  0xee   :  { %v413_v9 = vpop.f32.mrf.mxu0 }
  0xef   :  { %417 = vmatprep.subr.mxu1 %v413_v9 }
  0xf0   :  { %v146_v10 = vpop.f32.mrf.mxu0  ;;  %418 = vmatpush3.msra.mxu1 %v413_v9 }
  0xf1   :  { %419 = vmatprep.subr.mxu1 %v146_v10 }
  0xf2   :  { %v416_v13 = vpop.f32.mrf.mxu0  ;;  %420 = vmatpush3.msra.mxu1 %v146_v10 }
  0xf3   :  { %422 = vmatmul.mubr.msk.f32.vlgmr.msra.gmra.mxu1 %vm169_vm1, %v166_v11  ;;  %424 = vmatprep.subr.mxu1 %v416_v13 }
  0xf4   :  { %v156_v14 = vpop.f32.mrf.mxu0  ;;  %425 = vmatpush3.msra.mxu1 %v416_v13  ;;  %428 = vmatprep.mubr.msk.f32.mxu1 %vm169_vm1, %v167_v12 }
  0xf5   :  { %426 = vmatprep.subr.mxu1 %v156_v14 }
  0xf6   :  { %427 = vmatpush3.msra.mxu1 %v156_v14 }
  0xf7   :  { %429 = vmatmul.mubr.msk.f32.vlgmr.msra.gmra.mxu1 %vm169_vm1, %v168_v15 }
 0x1b3   :  { %v423_v19 = vpop.f32.mrf.mxu1 }
 0x1b4   :  { %v338_v20 = vsel %vm334_vm2, %v423_v19, %v413_v9 }
 0x1b5   :  { %v349_v21 = vadd.f32 %v386_v18, %v338_v20  ;;  %v242_v22 = vpop.f32.mrf.mxu1 }
 0x1b6   :  { %v337_v23 = vsel %vm334_vm2, %v242_v22, %v146_v10 }
 0x1b7   :  { %v353_v24 = vmax.f32 %v349_v21, 0.0  ;;  %v348_v25 = vadd.f32 %v386_v18, %v337_v23  ;;  %v430_v26 = vpop.f32.mrf.mxu1 }
 0x1b8   :  { %v340_v27 = vsel %vm334_vm2, %v430_v26, %v416_v13 }
 0x1b9   :  { %357 = vst [vmem:[#allocation8 + $0x8] sm:$0xff] %v353_v24  ;;  %v352_v28 = vmax.f32 %v348_v25, 0.0  ;;  %v351_v29 = vadd.f32 %v386_v18, %v340_v27  ;;  %v323_v30 = vpop.f32.mrf.mxu1 }
 0x1ba   :  { %v339_v31 = vsel %vm334_vm2, %v323_v30, %v156_v14 }
 0x1bb   :  { %356 = vst [vmem:[#allocation8] sm:$0xff] %v352_v28  ;;  %v355_v32 = vmax.f32 %v351_v29, 0.0  ;;  %v350_v33 = vadd.f32 %v386_v18, %v339_v31 }
 0x1bd   :  { %359 = vst [vmem:[#allocation8 + $0x18] sm:$0xff] %v355_v32  ;;  %v354_v34 = vmax.f32 %v350_v33, 0.0 }
 0x1bf   :  { %358 = vst [vmem:[#allocation8 + $0x10] sm:$0xff] %v354_v34 }
 0x1c0   :  { %508 = shalt.err (!%p505_p5)
}
 0x1c1   :  { %371 = dma.vmem_to_hbm [thread:$0]  %s366_s6, 512, %s593_s4, [#allocation4], %s525_s20, %s525_s20, %s526_s21  }
 0x1c2   :  { %521 = dma.done.wait [#allocation4], 512  }
 0x1c3   :  { %522 = vsyncadd [#allocation4], 4294966784 }
 0x1c4   :  { %375 = vsyncpa [#allocation3], 1 }
 0x1c5   :  { %376 = vsyncpa [#allocation6], 1 }
 0x1c6   :  { %377 = vsyncpa [#allocation4], 1 }

</bundles_post_ra>
